<compile_context>
chip_gen: v6e
topology: v6e:2x2x1
jax: 0.10.0
libtpu: 0.0.40
codegen_flags: <defaults>
</compile_context>

<pallas_src>
import functools

import jax
import jax.numpy as jnp
from jax.experimental import pallas as pl
from jax.experimental.pallas import tpu as pltpu


def _kl_loss_kernel(a_ref, p_ref, n_ref, diff_ref, l2_ref, *, fold):
    """grid = (split, step): split is 'parallel', step is the 'arbitrary'
    reduction axis.  diff_ref / l2_ref are (acc_rows, D) partial-sum blocks
    resident across the step axis."""
    j = pl.program_id(1)

    @pl.when(j == 0)
    def _init():
        diff_ref[...] = jnp.zeros_like(diff_ref)
        l2_ref[...] = jnp.zeros_like(l2_ref)

    a = a_ref[...].astype(jnp.float32)   # target probabilities
    p = p_ref[...].astype(jnp.float32)   # log-probabilities (positive)
    n = n_ref[...].astype(jnp.float32)   # log-probabilities (negative)

    # relu(negative - positive) only needs sum(a * (p - n)) / B:
    # the xlogy(a, a) term cancels exactly, so no log / where is needed.
    diff = a * (p - n)
    l2 = a * a + p * p                   # fused single l2 reduction

    if fold > 1:
        # Fold groups of acc_rows (=8) rows with pure VPU adds; the full
        # cross-lane/sublane collapse is deferred to the wrapper.
        rows = diff_ref.shape[0]
        d_acc = diff[0:rows, :]
        l_acc = l2[0:rows, :]
        for r in range(1, fold):
            d_acc = d_acc + diff[r * rows:(r + 1) * rows, :]
            l_acc = l_acc + l2[r * rows:(r + 1) * rows, :]
        diff, l2 = d_acc, l_acc

    diff_ref[...] += diff
    l2_ref[...] += l2


# Conservative VMEM budget for the 3 inputs x 2 pipeline buffers:
# works on v5e / v6e (128 MiB physical) and v7x (64 MiB physical).
_VMEM_PIPELINE_BUDGET = 32 * 1024 * 1024
_VMEM_LIMIT_BYTES = 48 * 1024 * 1024


def _choose_tiling(B, D, itemsize, max_row_tile=None):
    """Returns (num_splits, rows_per_split, row_tile)."""
    # 2-way split so megacore (v7x) can run both TensorCores on this reduction.
    num_splits = 2 if (B >= 16 and B % 16 == 0) else 1
    rows_per_split = B // num_splits
    if rows_per_split % 8 != 0:
        # Tiny / ragged batch: single block equal to the full array
        # (block dims == array dims, so the (8,128) constraint does not apply).
        return 1, B, B
    # Largest multiple of 8 that keeps 3 inputs x 2 buffers within budget.
    budget_rows = _VMEM_PIPELINE_BUDGET // (6 * D * itemsize)
    row_tile = min(rows_per_split, max(8, (budget_rows // 8) * 8))
    if max_row_tile is not None:
        row_tile = min(row_tile, max(8, (max_row_tile // 8) * 8))
    while rows_per_split % row_tile != 0:
        row_tile -= 8
    return num_splits, rows_per_split, row_tile


def kl_loss_pallas(pdf_anchor, pdf_positive, pdf_negative, *, max_row_tile=None):
    B, D = pdf_anchor.shape
    assert pdf_positive.shape == (B, D) and pdf_negative.shape == (B, D)

    itemsize = jnp.dtype(pdf_anchor.dtype).itemsize
    num_splits, rows_per_split, row_tile = _choose_tiling(
        B, D, itemsize, max_row_tile)
    steps = rows_per_split // row_tile
    assert row_tile % 8 == 0 or row_tile == B, "row tile must be 8-aligned"

    if row_tile % 8 == 0:
        acc_rows, fold = 8, row_tile // 8
    else:  # single full-array block for tiny batches
        acc_rows, fold = row_tile, 1

    kernel = functools.partial(_kl_loss_kernel, fold=fold)

    in_map = lambda i, j: (i * steps + j, 0)
    acc_map = lambda i, j: (i, 0)   # same block across j -> resident accumulator

    diff_part, l2_part = pl.pallas_call(
        kernel,
        out_shape=(
            jax.ShapeDtypeStruct((num_splits * acc_rows, D), jnp.float32),
            jax.ShapeDtypeStruct((num_splits * acc_rows, D), jnp.float32),
        ),
        grid_spec=pltpu.PrefetchScalarGridSpec(
            num_scalar_prefetch=0,
            grid=(num_splits, steps),
            in_specs=[
                pl.BlockSpec((row_tile, D), in_map),
                pl.BlockSpec((row_tile, D), in_map),
                pl.BlockSpec((row_tile, D), in_map),
            ],
            out_specs=[
                pl.BlockSpec((acc_rows, D), acc_map),
                pl.BlockSpec((acc_rows, D), acc_map),
            ],
        ),
        compiler_params=pltpu.CompilerParams(
            dimension_semantics=("parallel", "arbitrary"),
            vmem_limit_bytes=_VMEM_LIMIT_BYTES,
        ),
    )(pdf_anchor, pdf_positive, pdf_negative)

    # Tiny final reduction + relu + l2 scale in plain JAX.
    diff_sum = jnp.sum(diff_part)
    l2_sum = jnp.sum(l2_part)
    return jnp.maximum(diff_sum / B, 0.0) + 0.02 * l2_sum * 0.25


def kl_loss_ref(pdf_anchor, pdf_positive, pdf_negative):
    """Pure-JAX reference mirroring the PyTorch module (keeps the xlogx term
    to validate that the in-kernel cancellation is exact)."""
    B = pdf_anchor.shape[0]
    a = pdf_anchor.astype(jnp.float32)
    p = pdf_positive.astype(jnp.float32)
    n = pdf_negative.astype(jnp.float32)
    xlogx = jnp.where(a > 0, a * jnp.log(jnp.where(a > 0, a, 1.0)), 0.0)
    positive = jnp.sum(xlogx - a * p) / B
    negative = jnp.sum(xlogx - a * n) / B
    l2_loss = jnp.sum(a ** 2) + jnp.sum(p ** 2)
    return jax.nn.relu(negative - positive) + 0.02 * l2_loss * 0.25


if __name__ == "__main__":
    key = jax.random.PRNGKey(0)
    k1, k2, k3 = jax.random.split(key, 3)

    # Small shapes; max_row_tile=16 forces the multi-step + 2-way-split +
    # row-fold paths to be exercised even at this size.
    B, D = 64, 256
    pdf_anchor = jax.nn.softmax(
        jax.random.normal(k1, (B, D), jnp.float32), axis=-1)
    pdf_positive = jax.nn.log_softmax(
        jax.random.normal(k2, (B, D), jnp.float32), axis=-1)
    pdf_negative = jax.nn.log_softmax(
        jax.random.normal(k3, (B, D), jnp.float32), axis=-1)

    out = kl_loss_pallas(pdf_anchor, pdf_positive, pdf_negative,
                         max_row_tile=16)
    jax.block_until_ready(out)

    ref = kl_loss_ref(pdf_anchor, pdf_positive, pdf_negative)
    assert jnp.allclose(out, ref, rtol=1e-5, atol=1e-5), (out, ref)

    print("KERNEL_OK")
</pallas_src>

<mosaic_0001>
module attributes {stable_mosaic.version = 11 : i64} {
  func.func @_kl_loss_kernel(%arg0: i32, %arg1: i32, %arg2: memref<16x256xf32, #tpu.memory_space<vmem>>, %arg3: memref<16x256xf32, #tpu.memory_space<vmem>>, %arg4: memref<16x256xf32, #tpu.memory_space<vmem>>, %arg5: memref<8x256xf32, #tpu.memory_space<vmem>>, %arg6: memref<8x256xf32, #tpu.memory_space<vmem>>) attributes {dimension_semantics = [#tpu.dimension_semantics<parallel>, #tpu.dimension_semantics<arbitrary>], iteration_bounds = array<i64: 2, 2>, scalar_prefetch = 0 : i64, scratch_operands = 0 : i64, tpu.core_type = #tpu.core_type<tc>, window_params = [{transform_indices = @transform_0, window_bounds = array<i64: 16, 256>}, {transform_indices = @transform_1, window_bounds = array<i64: 16, 256>}, {transform_indices = @transform_2, window_bounds = array<i64: 16, 256>}, {transform_indices = @transform_3, window_bounds = array<i64: 8, 256>}, {transform_indices = @transform_4, window_bounds = array<i64: 8, 256>}]} {
    %c0_i32 = arith.constant 0 : i32
    %0 = arith.cmpi eq, %arg1, %c0_i32 : i32
    %1 = arith.extui %0 : i1 to i32
    %c0_i32_0 = arith.constant 0 : i32
    %2 = arith.cmpi ne, %1, %c0_i32_0 : i32
    scf.if %2 {
      %cst = arith.constant 0.000000e+00 : f32
      %23 = vector.broadcast %cst : f32 to vector<8x256xf32>
      %c0_14 = arith.constant 0 : index
      %c0_15 = arith.constant 0 : index
      %24 = vector.load %arg5[%c0_14, %c0_15] : memref<8x256xf32, #tpu.memory_space<vmem>>, vector<8x256xf32>
      tpu.vector_store %arg5[%c0_14, %c0_15], %23 {strides = array<i32>} : memref<8x256xf32, #tpu.memory_space<vmem>>, vector<8x256xf32>,
      %cst_16 = arith.constant 0.000000e+00 : f32
      %25 = vector.broadcast %cst_16 : f32 to vector<8x256xf32>
      %c0_17 = arith.constant 0 : index
      %c0_18 = arith.constant 0 : index
      %26 = vector.load %arg6[%c0_17, %c0_18] : memref<8x256xf32, #tpu.memory_space<vmem>>, vector<8x256xf32>
      tpu.vector_store %arg6[%c0_17, %c0_18], %25 {strides = array<i32>} : memref<8x256xf32, #tpu.memory_space<vmem>>, vector<8x256xf32>,
    } else {
    }
    %c0 = arith.constant 0 : index
    %c0_1 = arith.constant 0 : index
    %3 = vector.load %arg2[%c0, %c0_1] : memref<16x256xf32, #tpu.memory_space<vmem>>, vector<16x256xf32>
    %c0_2 = arith.constant 0 : index
    %c0_3 = arith.constant 0 : index
    %4 = vector.load %arg3[%c0_2, %c0_3] : memref<16x256xf32, #tpu.memory_space<vmem>>, vector<16x256xf32>
    %c0_4 = arith.constant 0 : index
    %c0_5 = arith.constant 0 : index
    %5 = vector.load %arg4[%c0_4, %c0_5] : memref<16x256xf32, #tpu.memory_space<vmem>>, vector<16x256xf32>
    %6 = arith.subf %4, %5 : vector<16x256xf32>
    %7 = arith.mulf %3, %6 : vector<16x256xf32>
    %8 = arith.mulf %3, %3 : vector<16x256xf32>
    %9 = arith.mulf %4, %4 : vector<16x256xf32>
    %10 = arith.addf %8, %9 : vector<16x256xf32>
    %11 = vector.extract_strided_slice %7 {offsets = [0, 0], sizes = [8, 256], strides = [1, 1]} : vector<16x256xf32> to vector<8x256xf32>
    %12 = vector.extract_strided_slice %10 {offsets = [0, 0], sizes = [8, 256], strides = [1, 1]} : vector<16x256xf32> to vector<8x256xf32>
    %13 = vector.extract_strided_slice %7 {offsets = [8, 0], sizes = [8, 256], strides = [1, 1]} : vector<16x256xf32> to vector<8x256xf32>
    %14 = arith.addf %11, %13 : vector<8x256xf32>
    %15 = vector.extract_strided_slice %10 {offsets = [8, 0], sizes = [8, 256], strides = [1, 1]} : vector<16x256xf32> to vector<8x256xf32>
    %16 = arith.addf %12, %15 : vector<8x256xf32>
    %c0_6 = arith.constant 0 : index
    %c0_7 = arith.constant 0 : index
    %17 = vector.load %arg5[%c0_6, %c0_7] : memref<8x256xf32, #tpu.memory_space<vmem>>, vector<8x256xf32>
    %18 = arith.addf %17, %14 : vector<8x256xf32>
    %c0_8 = arith.constant 0 : index
    %c0_9 = arith.constant 0 : index
    %19 = vector.load %arg5[%c0_8, %c0_9] : memref<8x256xf32, #tpu.memory_space<vmem>>, vector<8x256xf32>
    tpu.vector_store %arg5[%c0_8, %c0_9], %18 {strides = array<i32>} : memref<8x256xf32, #tpu.memory_space<vmem>>, vector<8x256xf32>,
    %c0_10 = arith.constant 0 : index
    %c0_11 = arith.constant 0 : index
    %20 = vector.load %arg6[%c0_10, %c0_11] : memref<8x256xf32, #tpu.memory_space<vmem>>, vector<8x256xf32>
    %21 = arith.addf %20, %16 : vector<8x256xf32>
    %c0_12 = arith.constant 0 : index
    %c0_13 = arith.constant 0 : index
    %22 = vector.load %arg6[%c0_12, %c0_13] : memref<8x256xf32, #tpu.memory_space<vmem>>, vector<8x256xf32>
    tpu.vector_store %arg6[%c0_12, %c0_13], %21 {strides = array<i32>} : memref<8x256xf32, #tpu.memory_space<vmem>>, vector<8x256xf32>,
    return
  }
  func.func @transform_0(%arg0: i32, %arg1: i32) -> (i32, i32) {
    %c2_i32 = arith.constant 2 : i32
    %0 = arith.muli %arg0, %c2_i32 : i32
    %1 = arith.addi %0, %arg1 : i32
    %c0_i32 = arith.constant 0 : i32
    %c0_i32_0 = arith.constant 0 : i32
    return %1, %c0_i32 : i32, i32
  }
  func.func @transform_1(%arg0: i32, %arg1: i32) -> (i32, i32) {
    %c2_i32 = arith.constant 2 : i32
    %0 = arith.muli %arg0, %c2_i32 : i32
    %1 = arith.addi %0, %arg1 : i32
    %c0_i32 = arith.constant 0 : i32
    %c0_i32_0 = arith.constant 0 : i32
    return %1, %c0_i32 : i32, i32
  }
  func.func @transform_2(%arg0: i32, %arg1: i32) -> (i32, i32) {
    %c2_i32 = arith.constant 2 : i32
    %0 = arith.muli %arg0, %c2_i32 : i32
    %1 = arith.addi %0, %arg1 : i32
    %c0_i32 = arith.constant 0 : i32
    %c0_i32_0 = arith.constant 0 : i32
    return %1, %c0_i32 : i32, i32
  }
  func.func @transform_3(%arg0: i32, %arg1: i32) -> (i32, i32) {
    %c0_i32 = arith.constant 0 : i32
    %c0_i32_0 = arith.constant 0 : i32
    return %arg0, %c0_i32 : i32, i32
  }
  func.func @transform_4(%arg0: i32, %arg1: i32) -> (i32, i32) {
    %c0_i32 = arith.constant 0 : i32
    %c0_i32_0 = arith.constant 0 : i32
    return %arg0, %c0_i32 : i32, i32
  }
}

</mosaic_0001>

<bundles_post_ra>
// kernel: tpu_custom_call.1
= control target key start
LH: loop header
LB: loop body
LE: loop exit
PB: predicated region body
PF: predicated region fallthrough
CT: control target
= control target key end

     0   :  { %s1366_s0 = inlined_call_operand.hbm [shape: f32[64,256], index: 0, kind: input, shape index: {}]   ;;  %s1367_s1 = inlined_call_operand.hbm [shape: f32[64,256], index: 1, kind: input, shape index: {}]   ;;  %s1368_s2 = inlined_call_operand.hbm [shape: f32[64,256], index: 2, kind: input, shape index: {}]   ;;  %s1369_s3 = inlined_call_operand.hbm [shape: f32[16,256], index: 3, kind: output, shape index: {0}]   ;;  %s1370_s4 = inlined_call_operand.hbm [shape: f32[16,256], index: 4, kind: output, shape index: {1}]  }
   0x1   :  { %1381 = sst [smem:[#allocation24_spill]] %s1366_s0 }
   0x2   :  { %1382 = sst [smem:[#allocation25_spill]] %s1367_s1 }
   0x3   :  { %10 = vsyncpa [#allocation3], 0 }
   0x4   :  { %12 = vsyncpa [#allocation3 + $0x1], 0 }
   0x5   :  { %13 = vsyncpa [#allocation6], 0 }
   0x6   :  { %15 = vsyncpa [#allocation6 + $0x1], 0 }
   0x7   :  { %16 = vsyncpa [#allocation4], 0 }
   0x8   :  { %18 = vsyncpa [#allocation4 + $0x1], 0 }
   0x9   :  { %19 = vsyncpa [#allocation10], 0 }
   0xa   :  { %21 = vsyncpa [#allocation10 + $0x1], 0  ;;  %s1039_s15 = smov 0   ;;  %s1041_s16 = smov 0  }
   0xb   :  { %s1043_s17 = smov 0   ;;  %s1045_s18 = smov 0  }
   0xc   :  { %s1047_s19 = smov 0   ;;  %s1049_s20 = smov 0  }
   0xd   :  { %s1051_s21 = smov 0   ;;  %s1053_s22 = smov 0  }
   0xe   :  { %s1055_s23 = smov 0   ;;  %s1057_s24 = smov 0  }
   0xf   :  { %s1059_s25 = smov 0  }
  0x10 LB: > { %1383 = sst [smem:[#allocation15_spill]] %s972_s17  ;;  %s1093_s26 = sadd.s32 4294967295, %s1004_s25   ;;  %s1004_s25 = sphi %s1059_s25, %s27_s25   ;;  %s1000_s24 = sphi %s1057_s24, %s1410_s24   ;;  %s996_s23 = sphi %s1055_s23, %s1409_s23   ;;  %s992_s22 = sphi %s1053_s22, %s1408_s22   ;;  %s988_s21 = sphi %s1051_s21, %s1407_s21   ;;  %s984_s20 = sphi %s1049_s20, %s1406_s20   ;;  %s980_s19 = sphi %s1047_s19, %s1414_s19   ;;  %s976_s18 = sphi %s1045_s18, %s1413_s18   ;;  %s972_s17 = sphi %s1043_s17, %s1404_s17   ;;  %s968_s16 = sphi %s1041_s16, %s1412_s16   ;;  %s964_s15 = sphi %s1039_s15, %s1411_s15  }
  0x11   : > { %1384 = sst [smem:[#allocation16_spill]] %s984_s20  ;;  %s599_s27 = sadd.s32 4294967294, %s1004_s25  }
  0x12   : > { %1385 = sst [smem:[#allocation17_spill]] %s996_s23  ;;  %s36_s28 = sadd.s32 1, %s996_s23 }
  0x13   : > { %1386 = sst [smem:[#allocation18_spill]] %s1000_s24  ;;  %s39_s29 = sadd.s32 1, %s1000_s24 }
  0x14   : > { %p37_p0 = scmp.ge.s32.totalorder %s36_s28, 2  ;;  %s600_s30 = sshll.u32 %s1000_s24, 1 }
  0x15   : > { %s1100_s5 = sadd.s32 %s996_s23, %s600_s30  ;;  %s50_s6 = sadd.s32 1, %s984_s20 }
  0x16   : > { %s1416_s28 = smov (%p37_p0, %s36_s28), 0  ;;  %s1418_s29 = smov (!%p37_p0, %s39_s29), %s1000_s24 }
  0x17   : > { %1387 = sst [smem:[#allocation19_spill]] %s1416_s28  ;;  %p57_p1 = scmp.ne.s32.totalorder %s984_s20, %s980_s19 }
  0x18   : > { %p58_p2 = scmp.eq.s32.totalorder %s1004_s25, 0  ;;  %p41_p3 = scmp.ge.s32.totalorder %s1418_s29, 2 }
  0x19   : > { %p63_p4 = scmp.ne.s32.totalorder %s980_s19, %s976_s18  ;;  %p64_p6 = scmp.eq.s32.totalorder %s1093_s26, 0 }
  0x1a   : > { %p1110_p5 = por %p58_p2, %p57_p1  ;;  %s1420_s29 = smov (%p41_p3, %s1418_s29), 0 }
  0x1b   : > { %1389 = sst [smem:[#allocation20_spill]] %s1420_s29  ;;  %p1117_p7 = por %p64_p6, %p63_p4 }
  0x1c   : > { %s136_s9 = sadd.s32 1, %s972_s17  ;;  %s601_s10 = sshll.u32 %s1420_s29, 1 }
  0x1d   : > { %s133_s11 = ssub.s32 %s1000_s24, %s1420_s29  ;;  %s46_s12 = sadd.s32 %s601_s10, %s1416_s28 }
  0x1e   : > { %p134_p8 = scmp.eq.s32.totalorder %s133_s11, 0  ;;  %s47_s13 = ssub.s32 %s1100_s5, %s46_s12 }
  0x1f   : > { %p146_p9 = scmp.ne.s32.totalorder %s972_s17, %s968_s16  ;;  %p48_p10 = scmp.eq.s32.totalorder %s47_s13, 0 }
  0x20   : > { %p147_p11 = scmp.eq.s32.totalorder %s1093_s26, 3  ;;  %p152_p13 = scmp.ne.s32.totalorder %s968_s16, %s964_s15 }
  0x21   : > { %s1131_s14 = scalar_select %p134_p8, %s972_s17, %s136_s9  }
  0x22   : > { %s1134_s18 = scalar_select %p48_p10, %s984_s20, %s50_s6  }
  0x23   : > { %1391 = sst [smem:[#allocation21_spill]] %s1131_s14  ;;  %p1136_p12 = por %p147_p11, %p146_p9 }
  0x24   : > { %1392 = sst [smem:[#allocation22_spill]] %s1134_s18  ;;  %p153_p0 = scmp.eq.s32.totalorder %s599_s27, 3 }
  0x25   : > { %p673_p1 = scmp.lt.s32.totalorder %s1004_s25, 4  ;;  %s1375_s10 = sand.u32 1, %s984_s20  }
  0x26   : > { %p1146_p2 = por %p153_p0, %p152_p13  ;;  %s1152_s12 = sshll.u32 %s1375_s10, 5 }
  0x27   : > { %s1155_s9 = sshll.u32 %s1100_s5, 9  ;;  %p1159_p3 = pnand %p673_p1, %p1110_p5 }
  0x28   : > { %s1394_s11 = scalar_select %p1146_p2, 1, 0 }
  0x29   : > { %s223_s27 = sand.u32 1, %s1004_s25   ;;  %s1397_s1 = sld [smem:[#allocation25_spill]] }
  0x2a   : > { %1395 = sst [smem:[#allocation23_spill]] %s1394_s11  ;;  %s227_s24 = scalar_lea.vmem [#allocation5], %s1152_s12 }
  0x2b   : > { %s237_s23 = sshll.u32 %s227_s24, 4  ;;  %p623_p4 = scmp.ge.s32.totalorder %s1004_s25, 1  ;;  %s238_s23 = int_to_ptr.vmem [resolvable:$true] %s237_s23 }
  0x2c   : > { %s1170_s10 = scalar_lea.sflag [#allocation6], %s223_s27  ;;  %p768_p6 = pneg %p1159_p3 }
  0x2d   : > { %s779_s5 = scalar_lea.vmem %s238_s23, 512  ;;  %s1006_s7 = smov [#allocation5]  }
  0x2e   : > { %p780_p5 = scmp.ne.s32.totalorder %s238_s23, %s779_s5  ;;  %s784_s18 = sshll.u32 %s1006_s7, 4  ;;  %s785_s18 = int_to_ptr.vmem [resolvable:$false] %s784_s18 }
  0x2f   : > { %s236_s28 = scalar_lea.hbm %s1397_s1, %s1155_s9  ;;  %s786_s14 = scalar_lea.vmem %s785_s18, 1024 }
  0x30   : > { %p782_p8 = pnand %p780_p5, %p768_p6  ;;  %p787_p10 = scmp.lt.s32.totalorder %s238_s23, %s785_s18 }
  0x31   : > { %p788_p11 = scmp.lt.s32.totalorder %s786_s14, %s779_s5 }
  0x32   : > { %p783_p9 = pneg %p782_p8 }
  0x33   : > { %p789_p13 = por %p788_p11, %p787_p10 }
  0x35   : > { %p790_p0 = pnand %p789_p13, %p783_p9 }
  0x37   : > { %793 = shalt.err (!%p790_p0)
}
  0x38   : > { %s1378_s24 = smov 256   ;;  %s1008_s29 = smov 16  }
  0x39   : > { %662 = dma.hbm_to_vmem [thread:$0]  (!%p1159_p3), %s236_s28, 512, %s238_s23, %s1170_s10, %s1378_s24, %s1378_s24, %s1008_s29  }
  0x3a   : > { %p269_p1 = scmp.lt.s32.totalorder %s1004_s25, 5  ;;  %s1399_s0 = sld [smem:[#allocation24_spill]] }
  0x3b   : > { %s203_s5 = scalar_lea.vmem [#allocation2], %s1152_s12  ;;  %s1400_s1 = sand.u32 1, %s984_s20  }
  0x3c   : > { %p1186_p5 = pnand %p623_p4, %p269_p1  ;;  %s213_s7 = sshll.u32 %s203_s5, 4  ;;  %s214_s7 = int_to_ptr.vmem [resolvable:$true] %s213_s7 }
  0x3d   : > { %s200_s17 = scalar_lea.sflag [#allocation3], %s1400_s1  ;;  %s807_s11 = scalar_lea.vmem %s214_s7, 512 }
  0x3e   : > { %p808_p8 = scmp.ne.s32.totalorder %s214_s7, %s807_s11  ;;  %s1009_s23 = smov [#allocation2]  }
  0x3f   : > { %s812_s28 = sshll.u32 %s1009_s23, 4  ;;  %s813_s28 = int_to_ptr.vmem [resolvable:$false] %s812_s28 }
  0x40   : > { %s212_s13 = scalar_lea.hbm %s1399_s0, %s1155_s9  ;;  %p810_p9 = pnand %p808_p8, %p768_p6 }
  0x41   : > { %s814_s24 = scalar_lea.vmem %s813_s28, 1024  ;;  %p815_p4 = scmp.lt.s32.totalorder %s214_s7, %s813_s28 }
  0x42   : > { %p811_p10 = pneg %p810_p9  ;;  %p816_p11 = scmp.lt.s32.totalorder %s814_s24, %s807_s11 }
  0x44   : > { %p817_p13 = por %p816_p11, %p815_p4 }
  0x46   : > { %p818_p0 = pnand %p817_p13, %p811_p10 }
  0x48   : > { %821 = shalt.err (!%p818_p0)
}
  0x49   : > { %s1401_s18 = smov 256   ;;  %s260_s5 = scalar_lea.hbm %s1368_s2, %s1155_s9 }
  0x4a   : > { %659 = dma.hbm_to_vmem [thread:$0]  (!%p1159_p3), %s212_s13, 512, %s214_s7, %s200_s17, %s1401_s18, %s1401_s18, %s1008_s29  }
  0x4b   : > { %s251_s23 = scalar_lea.vmem [#allocation7], %s1152_s12  ;;  %s1010_s24 = smov [#allocation7]  }
  0x4c   : > { %s261_s0 = sshll.u32 %s251_s23, 4  ;;  %s840_s28 = sshll.u32 %s1010_s24, 4  ;;  %s262_s0 = int_to_ptr.vmem [resolvable:$true] %s261_s0  ;;  %s841_s28 = int_to_ptr.vmem [resolvable:$false] %s840_s28 }
  0x4d   : > { %s835_s11 = scalar_lea.vmem %s262_s0, 512  ;;  %s842_s20 = scalar_lea.vmem %s841_s28, 1024 }
  0x4e   : > { %p836_p1 = scmp.ne.s32.totalorder %s262_s0, %s835_s11  ;;  %p843_p10 = scmp.lt.s32.totalorder %s262_s0, %s841_s28 }
  0x4f   : > { %p844_p4 = scmp.lt.s32.totalorder %s842_s20, %s835_s11 }
  0x50   : > { %p838_p8 = pnand %p836_p1, %p768_p6 }
  0x51   : > { %p845_p11 = por %p844_p4, %p843_p10 }
  0x52   : > { %p839_p9 = pneg %p838_p8 }
  0x54   : > { %p846_p13 = pnand %p845_p11, %p839_p9 }
  0x56   : > { %849 = shalt.err (!%p846_p13)
}
  0x57   : > { %665 = dma.hbm_to_vmem [thread:$0]  (!%p1159_p3), %s260_s5, 512, %s262_s0, %s1170_s10, %s1401_s18, %s1401_s18, %s1008_s29  }
  0x58   : > { %273 = sbr.rel (%p1186_p5) target bundleno = 156 (0x9c), region = 32  ;;  %s275_s17 = sand.u32 (!%p1186_p5), 1, %s980_s19  }
  0x59   : > { %s624_s12 = sshll.u32 (!%p1186_p5), %s275_s17, 5  ;;  %s276_s9 = scalar_lea.sflag (!%p1186_p5), [#allocation3], %s275_s17 }
  0x5a   : > { %s1222_s13 = scalar_lea.vmem (!%p1186_p5), [#allocation2], %s624_s12 }
  0x5d   : > { %947 = dma.done.wait (%p1117_p7), %s276_s9, 512  }
  0x5e   : > { %949 = vsyncadd (%p1117_p7), %s276_s9, 4294966784  ;;  %s284_s20 = sand.u32 1, %s1093_s26   ;;  %s1229_s0 = scalar_lea.vmem [#allocation5], %s624_s12 }
  0x5f   : > { %s285_s6 = scalar_lea.sflag [#allocation6], %s284_s20 }
  0x60   : > { %951 = dma.done.wait (%p1117_p7), %s285_s6, 1024  }
  0x61   : > { %953 = vsyncadd (%p1117_p7), %s285_s6, 4294966272  ;;  %s1236_s10 = sand.u32 1, %s968_s16   ;;  %s1239_s14 = scalar_lea.vmem [#allocation7], %s624_s12 }
  0x62   : > { %s627_s29 = sshll.u32 %s1236_s10, 4  ;;  %p629_p3 = scmp.ne.s32.totalorder %s988_s21, 0 }
  0x63   : > { %s1241_s7 = scalar_lea.vmem [#allocation8], %s627_s29  ;;  %s1243_s18 = scalar_lea.vmem [#allocation9], %s627_s29 }
  0x64   : > { %349 = sbr.rel (%p629_p3) target bundleno = 108 (0x6c), region = 48 }
  0x69   : > { %v1011_v0 = vmov 0.0  }
  0x6a   : > { %350 = vst [vmem:[%s1241_s7] sm:$0xff] %v1011_v0  ;;  %351 = vst [vmem:[%s1241_s7 + $0x8] sm:$0xff] %v1011_v0 }
  0x6b   : > { %352 = vst [vmem:[%s1243_s18] sm:$0xff] %v1011_v0  ;;  %353 = vst [vmem:[%s1243_s18 + $0x8] sm:$0xff] %v1011_v0 }
  0x6c PF: > { %v354_v1 = vld [vmem:[%s1222_s13] sm:$0xff]  ;;  %v356_v2 = vld [vmem:[%s1222_s13 + $0x10] sm:$0xff]  ;;  %v355_v12 = vld [vmem:[%s1222_s13 + $0x8] sm:$0xff]  ;;  %s644_s21 = sshll.u32 %s992_s22, 8  ;;  %s422_s26 = sshll.u32 %s1241_s7, 4  ;;  %s1276_s26 = int_to_ptr.vmem [resolvable:$true] %s422_s26 }
  0x6d   : > { %v358_v3 = vld [vmem:[%s1229_s0] sm:$0xff]  ;;  %v360_v4 = vld [vmem:[%s1229_s0 + $0x10] sm:$0xff]  ;;  %v374_v7 = vmul.f32 %v354_v1, %v354_v1  ;;  %v376_v8 = vmul.f32 %v356_v2, %v356_v2  ;;  %v357_v13 = vld [vmem:[%s1222_s13 + $0x18] sm:$0xff]  ;;  %v375_v19 = vmul.f32 %v355_v12, %v355_v12  ;;  %s436_s8 = sshll.u32 %s1243_s18, 4  ;;  %s1274_s5 = scalar_lea.hbm %s1369_s3, %s644_s21  ;;  %s1283_s8 = int_to_ptr.vmem [resolvable:$true] %s436_s8 }
  0x6e   : > { %v362_v5 = vld [vmem:[%s1239_s14] sm:$0xff]  ;;  %v364_v6 = vld [vmem:[%s1239_s14 + $0x10] sm:$0xff]  ;;  %v378_v9 = vmul.f32 %v358_v3, %v358_v3  ;;  %v380_v14 = vmul.f32 %v360_v4, %v360_v4  ;;  %v359_v15 = vld [vmem:[%s1229_s0 + $0x8] sm:$0xff]  ;;  %v377_v20 = vmul.f32 %v357_v13, %v357_v13  ;;  %s1281_s11 = scalar_lea.hbm %s1370_s4, %s644_s21  ;;  %s403_s24 = scalar_lea.sflag [#allocation4], %s1236_s10 }
  0x6f   : > { %v366_v10 = vsub.f32 %v358_v3, %v362_v5  ;;  %v368_v11 = vsub.f32 %v360_v4, %v364_v6  ;;  %v361_v16 = vld [vmem:[%s1229_s0 + $0x18] sm:$0xff]  ;;  %v363_v17 = vld [vmem:[%s1239_s14 + $0x8] sm:$0xff]  ;;  %v379_v29 = vmul.f32 %v359_v15, %v359_v15  ;;  %s850_s28 = scalar_lea.vmem %s1276_s26, 256  ;;  %s1012_s17 = smov [#allocation8]  }
  0x70   : > { %v382_v18 = vadd.f32 %v378_v9, %v374_v7  ;;  %v365_v23 = vld [vmem:[%s1239_s14 + $0x18] sm:$0xff]  ;;  %v367_v24 = vsub.f32 %v359_v15, %v363_v17  ;;  %v384_v25 = vadd.f32 %v380_v14, %v376_v8  ;;  %v381_v30 = vmul.f32 %v361_v16, %v361_v16  ;;  %p851_p7 = scmp.ne.s32.totalorder %s1276_s26, %s850_s28  ;;  %s854_s12 = sshll.u32 %s1012_s17, 4  ;;  %s855_s12 = int_to_ptr.vmem [resolvable:$false] %s854_s12 }
  0x71   : > { %v370_v21 = vmul.f32 %v366_v10, %v354_v1  ;;  %v372_v22 = vmul.f32 %v368_v11, %v356_v2  ;;  %v390_v26 = vld [vmem:[%s1241_s7] sm:$0xff]  ;;  %v369_v27 = vsub.f32 %v361_v16, %v365_v23  ;;  %v383_v35 = vadd.f32 %v379_v29, %v375_v19  ;;  %v391_v38 = vld [vmem:[%s1241_s7 + $0x8] sm:$0xff]  ;;  %s856_s9 = scalar_lea.vmem %s855_s12, 512  ;;  %p857_p0 = scmp.lt.s32.totalorder %s1276_s26, %s855_s12 }
  0x72   : > { %v396_v28 = vld [vmem:[%s1243_s18] sm:$0xff]  ;;  %v371_v32 = vmul.f32 %v367_v24, %v355_v12  ;;  %v388_v33 = vadd.f32 %v384_v25, %v382_v18  ;;  %v385_v36 = vadd.f32 %v381_v30, %v377_v20  ;;  %v397_v40 = vld [vmem:[%s1243_s18 + $0x8] sm:$0xff]  ;;  %p852_p6 = pnand %p851_p7, %p1136_p12  ;;  %p858_p1 = scmp.lt.s32.totalorder %s856_s9, %s850_s28 }
  0x73   : > { %v386_v31 = vadd.f32 %v372_v22, %v370_v21  ;;  %v373_v34 = vmul.f32 %v369_v27, %v357_v13 }
  0x74   : > { %v398_v39 = vadd.f32 %v396_v28, %v388_v33  ;;  %v389_v42 = vadd.f32 %v385_v36, %v383_v35  ;;  %p853_p5 = pneg %p852_p6  ;;  %p859_p8 = por %p858_p1, %p857_p0 }
  0x75   : > { %v392_v37 = vadd.f32 %v390_v26, %v386_v31  ;;  %v387_v41 = vadd.f32 %v373_v34, %v371_v32 }
  0x76   : > { %400 = vst [vmem:[%s1243_s18] sm:$0xff] %v398_v39  ;;  %v399_v44 = vadd.f32 %v397_v40, %v389_v42  ;;  %p860_p9 = pnand %p859_p8, %p853_p5 }
  0x77   : > { %394 = vst [vmem:[%s1241_s7] sm:$0xff] %v392_v37  ;;  %v393_v43 = vadd.f32 %v391_v38, %v387_v41 }
  0x78   : > { %401 = vst [vmem:[%s1243_s18 + $0x8] sm:$0xff] %v399_v44 }
  0x79   : > { %395 = vst [vmem:[%s1241_s7 + $0x8] sm:$0xff] %v393_v43 }
  0x7a   : > { %863 = shalt.err (!%p860_p9)
}
  0x7b   : > { %s864_s13 = scalar_lea.hbm %s1274_s5, 256  ;;  %s868_s0 = scalar_lea.hbm %s1369_s3, 512 }
  0x7c   : > { %p865_p10 = scmp.ne.s32.totalorder %s1274_s5, %s864_s13  ;;  %p869_p13 = scmp.lt.s32.totalorder %s1274_s5, %s1369_s3 }
  0x7d   : > { %p870_p3 = scmp.lt.s32.totalorder %s868_s0, %s864_s13 }
  0x7e   : > { %p866_p4 = pnand %p865_p10, %p1136_p12 }
  0x7f   : > { %p871_p7 = por %p870_p3, %p869_p13 }
  0x80   : > { %p867_p11 = pneg %p866_p4 }
  0x82   : > { %p872_p6 = pnand %p871_p7, %p867_p11 }
  0x84   : > { %875 = shalt.err (!%p872_p6)
}
  0x85   : > { %652 = dma.vmem_to_hbm [thread:$0]  (%p1136_p12), %s1276_s26, 256, %s1274_s5, %s403_s24  }
  0x86   : > { %s408_s7 = scalar_lea.sflag [#allocation10], %s1236_s10  ;;  %s876_s18 = scalar_lea.vmem %s1283_s8, 256 }
  0x87   : > { %p877_p5 = scmp.ne.s32.totalorder %s1283_s8, %s876_s18  ;;  %s1013_s21 = smov [#allocation9]  }
  0x88   : > { %s880_s1 = sshll.u32 %s1013_s21, 4  ;;  %s881_s1 = int_to_ptr.vmem [resolvable:$false] %s880_s1 }
  0x89   : > { %p878_p0 = pnand %p877_p5, %p1136_p12  ;;  %s882_s27 = scalar_lea.vmem %s881_s1, 512 }
  0x8a   : > { %p883_p8 = scmp.lt.s32.totalorder %s1283_s8, %s881_s1  ;;  %p884_p9 = scmp.lt.s32.totalorder %s882_s27, %s876_s18 }
  0x8b   : > { %p879_p1 = pneg %p878_p0 }
  0x8c   : > { %p885_p10 = por %p884_p9, %p883_p8 }
  0x8e   : > { %p886_p4 = pnand %p885_p10, %p879_p1 }
  0x90   : > { %889 = shalt.err (!%p886_p4)
}
  0x91   : > { %s890_s26 = scalar_lea.hbm %s1281_s11, 256  ;;  %s894_s22 = scalar_lea.hbm %s1370_s4, 512 }
  0x92   : > { %p891_p11 = scmp.ne.s32.totalorder %s1281_s11, %s890_s26  ;;  %p895_p7 = scmp.lt.s32.totalorder %s1281_s11, %s1370_s4 }
  0x93   : > { %p896_p6 = scmp.lt.s32.totalorder %s894_s22, %s890_s26 }
  0x94   : > { %p892_p13 = pnand %p891_p11, %p1136_p12 }
  0x95   : > { %p897_p5 = por %p896_p6, %p895_p7 }
  0x96   : > { %p893_p3 = pneg %p892_p13 }
  0x98   : > { %p898_p0 = pnand %p897_p5, %p893_p3 }
  0x9a   : > { %901 = shalt.err (!%p898_p0)
}
  0x9b   : > { %653 = dma.vmem_to_hbm [thread:$0]  (%p1136_p12), %s1283_s8, 256, %s1281_s11, %s408_s7  }
  0x9c PF: > { %p674_p1 = scmp.ge.s32.totalorder %s1004_s25, 2  ;;  %s448_s17 = sand.u32 1, %s964_s15  }
  0x9d   : > { %s449_s12 = scalar_lea.sflag [#allocation4], %s448_s17 }
  0x9e   : > { %p667_p8 = pnand %p674_p1, %p1146_p2 }
  0xa0   : > { %p668_p9 = pneg %p667_p8 }
  0xa2   : > { %955 = dma.done.wait (%p668_p9), %s449_s12, 256  }
  0xa3   : > { %957 = vsyncadd (%p668_p9), %s449_s12, 4294967040  ;;  %s458_s9 = scalar_lea.sflag [#allocation10], %s448_s17 }
  0xa4   : > { %959 = dma.done.wait (%p668_p9), %s458_s9, 256  }
  0xa5   : > { %961 = vsyncadd (%p668_p9), %s458_s9, 4294967040  ;;  %s27_s25 = sadd.s32 1, %s1004_s25   ;;  %s1403_s30 = sld [smem:[#allocation15_spill]] }
  0xa6   : > { %p24_p10 = scmp.ge.s32.totalorder %s27_s25, 6   ;;  %s1404_s17 = sld [smem:[#allocation21_spill]] }
  0xa7   : > { %s1405_s8 = sld [smem:[#allocation16_spill]]  ;;  %s1411_s15 = smov %s968_s16 }
  0xa8   : > { %s1406_s20 = sld [smem:[#allocation22_spill]]  ;;  %s1413_s18 = smov %s980_s19 }
  0xa9   : > { %s1407_s21 = sld [smem:[#allocation17_spill]]  ;;  %26 = sbr.rel (!%p24_p10) target bundleno = 16 (0x10), region = 122 }
  0xaa   : > { %s1408_s22 = sld [smem:[#allocation18_spill]] }
  0xab   : > { %s1409_s23 = sld [smem:[#allocation19_spill]]  ;;  %s1412_s16 = smov %s1403_s30 }
  0xac   : > { %s1410_s24 = sld [smem:[#allocation20_spill]] }
  0xad   : > { %s1414_s19 = smov %s1405_s8 }
  0xae   :  { %463 = vsyncpa [#allocation3], 1 }
  0xaf   :  { %465 = vsyncpa [#allocation3 + $0x1], 1 }
  0xb0   :  { %466 = vsyncpa [#allocation6], 1 }
  0xb1   :  { %468 = vsyncpa [#allocation6 + $0x1], 1 }
  0xb2   :  { %469 = vsyncpa [#allocation4], 1 }
  0xb3   :  { %471 = vsyncpa [#allocation4 + $0x1], 1 }
  0xb4   :  { %472 = vsyncpa [#allocation10], 1 }
  0xb5   :  { %474 = vsyncpa [#allocation10 + $0x1], 1 }

</bundles_post_ra>
